<compile_context>
chip_gen: v7x
topology: tpu7x:2x2x1
jax: 0.10.0
libtpu: 0.0.40
codegen_flags: <defaults>
</compile_context>

<pallas_src>
import functools

import jax
import jax.numpy as jnp
from jax.experimental import pallas as pl
from jax.experimental.pallas import tpu as pltpu


def _round_up(x, m):
    return ((x + m - 1) // m) * m


def _cdiv(a, b):
    return -(-a // b)


def _choose_tile(batch, tile_b):
    """Pick a sublane-aligned batch tile and a (preferably even) step count."""
    tb = min(_round_up(tile_b, 8), _round_up(batch, 8))
    steps = _cdiv(batch, tb)
    if steps > 1:
        # v7x megacore: an even, balanced step count keeps both TCs busy.
        if steps % 2:
            steps += 1
        tb = _round_up(_cdiv(batch, steps), 8)
        steps = _cdiv(batch, tb)
    return tb, steps


def mlp_kernel(x_ref, w1_ref, b1_ref, w2_ref, b2_ref, w3_ref, b3_ref, o_ref):
    # Activations/weights in native dtype (bf16 goes straight to the MXU),
    # f32 accumulation, bias + ReLU fused on the f32 accumulator.
    h1 = jnp.dot(x_ref[...], w1_ref[...], preferred_element_type=jnp.float32)
    h1 = jnp.maximum(h1 + b1_ref[...].astype(jnp.float32), 0.0)

    h2 = jnp.dot(h1.astype(w2_ref.dtype), w2_ref[...],
                 preferred_element_type=jnp.float32)
    h2 = jnp.maximum(h2 + b2_ref[...].astype(jnp.float32), 0.0)

    out = jnp.dot(h2.astype(w3_ref.dtype), w3_ref[...],
                  preferred_element_type=jnp.float32)
    o_ref[...] = (out + b3_ref[...].astype(jnp.float32)).astype(o_ref.dtype)


@functools.partial(jax.jit, static_argnames=("tile_b",))
def mlp_forward(x, w1, b1, w2, b2, w3, b3, *, tile_b=2048):
    # nn.Linear semantics: operate on the last dim; flatten leading dims.
    orig_shape = x.shape
    D_in = orig_shape[-1]
    x2 = x.reshape((-1, D_in))
    B = x2.shape[0]

    H1 = w1.shape[1]
    H2 = w2.shape[1]
    D_out = w3.shape[1]

    tb, steps = _choose_tile(B, tile_b)

    out = pl.pallas_call(
        mlp_kernel,
        out_shape=jax.ShapeDtypeStruct((B, D_out), x.dtype),
        grid_spec=pltpu.PrefetchScalarGridSpec(
            num_scalar_prefetch=0,
            grid=(steps,),
            in_specs=[
                pl.BlockSpec((tb, D_in), lambda i: (i, 0)),     # x tile
                pl.BlockSpec((D_in, H1), lambda i: (0, 0)),     # W1 (resident)
                pl.BlockSpec((1, H1), lambda i: (0, 0)),        # b1
                pl.BlockSpec((H1, H2), lambda i: (0, 0)),       # W2 (resident)
                pl.BlockSpec((1, H2), lambda i: (0, 0)),        # b2
                pl.BlockSpec((H2, D_out), lambda i: (0, 0)),    # W3 (resident)
                pl.BlockSpec((1, D_out), lambda i: (0, 0)),     # b3
            ],
            out_specs=pl.BlockSpec((tb, D_out), lambda i: (i, 0)),
        ),
        compiler_params=pltpu.CompilerParams(
            # Rows are independent; multi-step grids shard across both
            # TensorCores on v7x.
            dimension_semantics=("parallel",),
        ),
    )(x2, w1, b1, w2, b2, w3, b3)

    return out.reshape(orig_shape[:-1] + (D_out,))


def ref_mlp(x, w1, b1, w2, b2, w3, b3):
    """Pure-JAX reference mirroring the kernel's dtype handling."""
    h1 = jnp.dot(x, w1, preferred_element_type=jnp.float32) + b1.astype(jnp.float32)
    h1 = jnp.maximum(h1, 0.0).astype(w2.dtype)
    h2 = jnp.dot(h1, w2, preferred_element_type=jnp.float32) + b2.astype(jnp.float32)
    h2 = jnp.maximum(h2, 0.0).astype(w3.dtype)
    out = jnp.dot(h2, w3, preferred_element_type=jnp.float32) + b3.astype(jnp.float32)
    return out.astype(x.dtype)


def init_linear(key, fan_in, fan_out, dtype=jnp.float32):
    # Mimic PyTorch nn.Linear init: U(-1/sqrt(fan_in), +1/sqrt(fan_in)).
    kw, kb = jax.random.split(key)
    bound = 1.0 / jnp.sqrt(jnp.array(fan_in, dtype=jnp.float32))
    w = jax.random.uniform(kw, (fan_in, fan_out), jnp.float32, -bound, bound)
    b = jax.random.uniform(kb, (1, fan_out), jnp.float32, -bound, bound)
    return w.astype(dtype), b.astype(dtype)


if __name__ == "__main__":
    # Module shapes: input_dim -> 256 -> 128 -> output_dim
    B, D_in, D_out = 8, 32, 16
    H1, H2 = 256, 128

    key = jax.random.PRNGKey(0)
    kx, k1, k2, k3 = jax.random.split(key, 4)

    # --- small f32 check (matches the PyTorch module's default dtype) ---
    # NOTE: jnp.dot with f32 inputs uses default (bf16-pass) MXU precision,
    # same as the pure-JAX reference; bit-exact f32 vs PyTorch would need
    # precision=HIGHEST in both.
    x = jax.random.normal(kx, (B, D_in), jnp.float32)
    w1, b1 = init_linear(k1, D_in, H1)
    w2, b2 = init_linear(k2, H1, H2)
    w3, b3 = init_linear(k3, H2, D_out)

    out = mlp_forward(x, w1, b1, w2, b2, w3, b3)
    out = jax.block_until_ready(out)
    ref = ref_mlp(x, w1, b1, w2, b2, w3, b3)
    assert out.shape == (B, D_out)
    assert jnp.allclose(out, ref, atol=1e-5, rtol=1e-5)

    # --- larger bf16 run: ragged batch (edge-block masking, no wrapper pad),
    # odd->even grid-step balancing, bf16 MXU path, multi-step grid ---
    Bb = 1000
    xb = jax.random.normal(kx, (Bb, D_in), jnp.float32).astype(jnp.bfloat16)
    w1b, b1b = w1.astype(jnp.bfloat16), b1.astype(jnp.bfloat16)
    w2b, b2b = w2.astype(jnp.bfloat16), b2.astype(jnp.bfloat16)
    w3b, b3b = w3.astype(jnp.bfloat16), b3.astype(jnp.bfloat16)

    outb = mlp_forward(xb, w1b, b1b, w2b, b2b, w3b, b3b, tile_b=384)
    outb = jax.block_until_ready(outb)
    refb = ref_mlp(xb, w1b, b1b, w2b, b2b, w3b, b3b)
    assert outb.shape == (Bb, D_out)
    assert jnp.allclose(outb.astype(jnp.float32), refb.astype(jnp.float32),
                        atol=2e-2, rtol=2e-2)

    print("KERNEL_OK")
</pallas_src>

<mosaic_0001>
module attributes {stable_mosaic.version = 11 : i64} {
  func.func @mlp_kernel(%arg0: i32, %arg1: memref<8x32xf32, #tpu.memory_space<vmem>>, %arg2: memref<32x256xf32, #tpu.memory_space<vmem>>, %arg3: memref<1x256xf32, #tpu.memory_space<vmem>>, %arg4: memref<256x128xf32, #tpu.memory_space<vmem>>, %arg5: memref<1x128xf32, #tpu.memory_space<vmem>>, %arg6: memref<128x16xf32, #tpu.memory_space<vmem>>, %arg7: memref<1x16xf32, #tpu.memory_space<vmem>>, %arg8: memref<8x16xf32, #tpu.memory_space<vmem>>) attributes {dimension_semantics = [#tpu.dimension_semantics<parallel>], iteration_bounds = array<i64: 1>, scalar_prefetch = 0 : i64, scratch_operands = 0 : i64, tpu.core_type = #tpu.core_type<tc>, window_params = [{transform_indices = @transform_0, window_bounds = array<i64: 8, 32>}, {pipeline_mode = #tpu.pipeline_mode<synchronous>, transform_indices = @transform_1, window_bounds = array<i64: 32, 256>}, {pipeline_mode = #tpu.pipeline_mode<synchronous>, transform_indices = @transform_2, window_bounds = array<i64: 1, 256>}, {pipeline_mode = #tpu.pipeline_mode<synchronous>, transform_indices = @transform_3, window_bounds = array<i64: 256, 128>}, {pipeline_mode = #tpu.pipeline_mode<synchronous>, transform_indices = @transform_4, window_bounds = array<i64: 1, 128>}, {pipeline_mode = #tpu.pipeline_mode<synchronous>, transform_indices = @transform_5, window_bounds = array<i64: 128, 16>}, {pipeline_mode = #tpu.pipeline_mode<synchronous>, transform_indices = @transform_6, window_bounds = array<i64: 1, 16>}, {transform_indices = @transform_7, window_bounds = array<i64: 8, 16>}]} {
    %c0 = arith.constant 0 : index
    %c0_0 = arith.constant 0 : index
    %0 = vector.load %arg1[%c0, %c0_0] : memref<8x32xf32, #tpu.memory_space<vmem>>, vector<8x32xf32>
    %c0_1 = arith.constant 0 : index
    %c0_2 = arith.constant 0 : index
    %1 = vector.load %arg2[%c0_1, %c0_2] : memref<32x256xf32, #tpu.memory_space<vmem>>, vector<32x256xf32>
    %cst = arith.constant dense<0.000000e+00> : vector<8x256xf32>
    %2 = tpu.matmul %0, %1, %cst {dimension_numbers = #tpu.dot_dimension_numbers<[1], [0], [0], [1], [0, 0, 1, 1], [], []>} : vector<8x32xf32>, vector<32x256xf32>, vector<8x256xf32> -> vector<8x256xf32>
    %c0_3 = arith.constant 0 : index
    %c0_4 = arith.constant 0 : index
    %3 = vector.load %arg3[%c0_3, %c0_4] : memref<1x256xf32, #tpu.memory_space<vmem>>, vector<1x256xf32>
    %4 = vector.broadcast %3 : vector<1x256xf32> to vector<8x256xf32>
    %5 = arith.addf %2, %4 : vector<8x256xf32>
    %cst_5 = arith.constant 0.000000e+00 : f32
    %6 = vector.broadcast %cst_5 : f32 to vector<8x256xf32>
    %7 = arith.maximumf %5, %6 : vector<8x256xf32>
    %c0_6 = arith.constant 0 : index
    %c0_7 = arith.constant 0 : index
    %8 = vector.load %arg4[%c0_6, %c0_7] : memref<256x128xf32, #tpu.memory_space<vmem>>, vector<256x128xf32>
    %cst_8 = arith.constant dense<0.000000e+00> : vector<8x128xf32>
    %9 = tpu.matmul %7, %8, %cst_8 {dimension_numbers = #tpu.dot_dimension_numbers<[1], [0], [0], [1], [0, 0, 1, 1], [], []>} : vector<8x256xf32>, vector<256x128xf32>, vector<8x128xf32> -> vector<8x128xf32>
    %c0_9 = arith.constant 0 : index
    %c0_10 = arith.constant 0 : index
    %10 = vector.load %arg5[%c0_9, %c0_10] : memref<1x128xf32, #tpu.memory_space<vmem>>, vector<1x128xf32>
    %11 = vector.broadcast %10 : vector<1x128xf32> to vector<8x128xf32>
    %12 = arith.addf %9, %11 : vector<8x128xf32>
    %cst_11 = arith.constant 0.000000e+00 : f32
    %13 = vector.broadcast %cst_11 : f32 to vector<8x128xf32>
    %14 = arith.maximumf %12, %13 : vector<8x128xf32>
    %c0_12 = arith.constant 0 : index
    %c0_13 = arith.constant 0 : index
    %15 = vector.load %arg6[%c0_12, %c0_13] : memref<128x16xf32, #tpu.memory_space<vmem>>, vector<128x16xf32>
    %cst_14 = arith.constant dense<0.000000e+00> : vector<8x16xf32>
    %16 = tpu.matmul %14, %15, %cst_14 {dimension_numbers = #tpu.dot_dimension_numbers<[1], [0], [0], [1], [0, 0, 1, 1], [], []>} : vector<8x128xf32>, vector<128x16xf32>, vector<8x16xf32> -> vector<8x16xf32>
    %c0_15 = arith.constant 0 : index
    %c0_16 = arith.constant 0 : index
    %17 = vector.load %arg7[%c0_15, %c0_16] : memref<1x16xf32, #tpu.memory_space<vmem>>, vector<1x16xf32>
    %18 = vector.broadcast %17 : vector<1x16xf32> to vector<8x16xf32>
    %19 = arith.addf %16, %18 : vector<8x16xf32>
    %c0_17 = arith.constant 0 : index
    %c0_18 = arith.constant 0 : index
    %20 = vector.load %arg8[%c0_17, %c0_18] : memref<8x16xf32, #tpu.memory_space<vmem>>, vector<8x16xf32>
    tpu.vector_store %arg8[%c0_17, %c0_18], %19 {strides = array<i32>} : memref<8x16xf32, #tpu.memory_space<vmem>>, vector<8x16xf32>,
    return
  }
  func.func @transform_0(%arg0: i32) -> (i32, i32) {
    %c0_i32 = arith.constant 0 : i32
    %c0_i32_0 = arith.constant 0 : i32
    return %arg0, %c0_i32 : i32, i32
  }
  func.func @transform_1(%arg0: i32) -> (i32, i32) {
    %c0_i32 = arith.constant 0 : i32
    %c0_i32_0 = arith.constant 0 : i32
    %c0_i32_1 = arith.constant 0 : i32
    return %c0_i32, %c0_i32_0 : i32, i32
  }
  func.func @transform_2(%arg0: i32) -> (i32, i32) {
    %c0_i32 = arith.constant 0 : i32
    %c0_i32_0 = arith.constant 0 : i32
    %c0_i32_1 = arith.constant 0 : i32
    return %c0_i32, %c0_i32_0 : i32, i32
  }
  func.func @transform_3(%arg0: i32) -> (i32, i32) {
    %c0_i32 = arith.constant 0 : i32
    %c0_i32_0 = arith.constant 0 : i32
    %c0_i32_1 = arith.constant 0 : i32
    return %c0_i32, %c0_i32_0 : i32, i32
  }
  func.func @transform_4(%arg0: i32) -> (i32, i32) {
    %c0_i32 = arith.constant 0 : i32
    %c0_i32_0 = arith.constant 0 : i32
    %c0_i32_1 = arith.constant 0 : i32
    return %c0_i32, %c0_i32_0 : i32, i32
  }
  func.func @transform_5(%arg0: i32) -> (i32, i32) {
    %c0_i32 = arith.constant 0 : i32
    %c0_i32_0 = arith.constant 0 : i32
    %c0_i32_1 = arith.constant 0 : i32
    return %c0_i32, %c0_i32_0 : i32, i32
  }
  func.func @transform_6(%arg0: i32) -> (i32, i32) {
    %c0_i32 = arith.constant 0 : i32
    %c0_i32_0 = arith.constant 0 : i32
    %c0_i32_1 = arith.constant 0 : i32
    return %c0_i32, %c0_i32_0 : i32, i32
  }
  func.func @transform_7(%arg0: i32) -> (i32, i32) {
    %c0_i32 = arith.constant 0 : i32
    %c0_i32_0 = arith.constant 0 : i32
    return %arg0, %c0_i32 : i32, i32
  }
}

</mosaic_0001>

<bundles_post_ra>
// kernel: mlp_forward.1
= control target key start
LH: loop header
LB: loop body
LE: loop exit
PB: predicated region body
PF: predicated region fallthrough
CT: control target
= control target key end

     0   :  { %12 = vsyncpa [#allocation3], 0  ;;  %s725_s0 = inlined_call_operand.vmem [shape: f32[8,32], index: 0, kind: input, shape index: {}]   ;;  %s726_s1 = inlined_call_operand.vmem [shape: f32[32,256], index: 1, kind: input, shape index: {}]   ;;  %s727_s2 = inlined_call_operand.vmem [shape: f32[1,256], index: 2, kind: input, shape index: {}]   ;;  %s728_s3 = inlined_call_operand.hbm [shape: f32[256,128], index: 3, kind: input, shape index: {}]   ;;  %s729_s4 = inlined_call_operand.vmem [shape: f32[1,128], index: 4, kind: input, shape index: {}]   ;;  %s730_s5 = inlined_call_operand.vmem [shape: f32[128,16], index: 5, kind: input, shape index: {}]   ;;  %s731_s6 = inlined_call_operand.vmem [shape: f32[1,16], index: 6, kind: input, shape index: {}]   ;;  %s732_s7 = inlined_call_operand.hbm [shape: f32[8,16], index: 7, kind: output, shape index: {}]  }
   0x1   :  { %13 = vsyncpa [#allocation4], 0  ;;  %s568_s24 = smov [#allocation2]   ;;  %s520_s28 = scalar_lea.hbm %s728_s3, 4096 }
   0x2   :  { %s25_s25 = sshll.u32 %s568_s24, 4  ;;  %p521_p0 = scmp.ne.s32.totalorder %s728_s3, %s520_s28  ;;  %s26_s25 = int_to_ptr.vmem [resolvable:$true] %s25_s25 }
   0x3   :  { %p524_p1 = scmp.lt.u32.totalorder %s520_s28, %s728_s3 }
   0x5   :  { %p526_p2 = pnand %p524_p1, %p521_p0 }
   0x7   :  { %529 = shalt.err (!%p526_p2)
}
   0x8   :  { %s530_s10 = scalar_lea.vmem %s26_s25, 4096  ;;  %p535_p4 = scmp.lt.s32.totalorder %s26_s25, %s26_s25 }
   0x9   :  { %p531_p3 = scmp.ne.s32.totalorder %s26_s25, %s530_s10  ;;  %p536_p5 = scmp.lt.s32.totalorder %s530_s10, %s530_s10 }
   0xb   :  { %p537_p6 = por %p536_p5, %p535_p4 }
   0xd   :  { %p538_p7 = pnand %p537_p6, %p531_p3 }
   0xf   :  { %541 = shalt.err (!%p538_p7)
}
  0x10   :  { %s569_s11 = smov 128   ;;  %s570_s12 = smov 8  }
  0x11   :  { %31 = dma.hbm_to_vmem [thread:$0]  %s728_s3, 4096, %s26_s25, [#allocation3], %s569_s11, %s569_s11, %s570_s12  }
  0x12   :  { %564 = dma.done.wait [#allocation3], 4096  }
  0x13   :  { %565 = vsyncadd [#allocation3], 4294963200  ;;  %v571_v0 = vmov 0.0   ;;  %v43_v1 = vld [vmem:[%s726_s1 + $0x8] sm:$0xff]  ;;  %v45_v2 = vld [vmem:[%s726_s1 + $0x18] sm:$0xff]  ;;  %vm62_vm0 = vcmask 261120  }
  0x14   :  { %130 = vmatprep.mubr.f32.mxu0 %v571_v0  ;;  %v42_v3 = vld [vmem:[%s726_s1] sm:$0xff]  ;;  %v449_v4 = vpack.c.bf16 %v45_v2, %v43_v1  ;;  %v44_v5 = vld [vmem:[%s726_s1 + $0x10] sm:$0xff]  ;;  %v47_v6 = vld [vmem:[%s726_s1 + $0x28] sm:$0xff]  ;;  %v572_v2 = vmov 0.0|0.0   ;;  %vm573_vm1 = vmmov 0   ;;  %vm342_vm2 = vcmask 130048  }
  0x15   :  { %v49_v7 = vld [vmem:[%s726_s1 + $0x38] sm:$0xff]  ;;  %v451_v8 = vpack.c.bf16 %v44_v5, %v42_v3  ;;  %v46_v10 = vld [vmem:[%s726_s1 + $0x20] sm:$0xff]  ;;  %v48_v11 = vld [vmem:[%s726_s1 + $0x30] sm:$0xff] }
  0x16   :  { %v453_v9 = vpack.c.bf16 %v49_v7, %v47_v6  ;;  %450 = vmatprep.subr.bf16.mxu0 %v449_v4  ;;  %v155_v12 = vld [vmem:[#allocation2 + $0x80] sm:$0xff]  ;;  %v156_v13 = vld [vmem:[#allocation2 + $0x88] sm:$0xff]  ;;  %v455_v15 = vpack.c.bf16 %v48_v11, %v46_v10  ;;  %v157_v18 = vld [vmem:[#allocation2 + $0x90] sm:$0xff] }
  0x17   :  { %v139_v14 = vld [vmem:[#allocation2] sm:$0xff]  ;;  %452 = vmatpush1.bf16.msra.mxu0 %v451_v8  ;;  %v457_v16 = vpack.c.bf16 %v156_v13, %v155_v12  ;;  %v140_v17 = vld [vmem:[#allocation2 + $0x8] sm:$0xff]  ;;  %v158_v19 = vld [vmem:[#allocation2 + $0x98] sm:$0xff] }
  0x18   :  { %454 = vmatprep.subr.bf16.mxu0 %v453_v9  ;;  %v459_v20 = vpack.c.bf16 %v140_v17, %v139_v14  ;;  %v461_v21 = vpack.c.bf16 %v158_v19, %v157_v18  ;;  %v141_v22 = vld [vmem:[#allocation2 + $0x10] sm:$0xff]  ;;  %v142_v23 = vld [vmem:[#allocation2 + $0x18] sm:$0xff]  ;;  %v159_v24 = vld [vmem:[#allocation2 + $0xa0] sm:$0xff]  ;;  %v52_v18 = vlaneseq }
  0x19   :  { %458 = vmatprep.subr.bf16.mxu1 %v457_v16  ;;  %v160_v25 = vld [vmem:[#allocation2 + $0xa8] sm:$0xff]  ;;  %v463_v26 = vpack.c.bf16 %v142_v23, %v141_v22  ;;  %v41_v27 = vld [vmem:[%s725_s0] sm:$0xff]  ;;  %v161_v31 = vld [vmem:[#allocation2 + $0xb0] sm:$0xff] }
  0x1a   :  { %460 = vmatpush3.bf16.msra.mxu1 %v459_v20  ;;  %v465_v28 = vpack.c.bf16 %v160_v25, %v159_v24  ;;  %v143_v29 = vld [vmem:[#allocation2 + $0x20] sm:$0xff]  ;;  %v144_v30 = vld [vmem:[#allocation2 + $0x28] sm:$0xff]  ;;  %v162_v32 = vld [vmem:[#allocation2 + $0xb8] sm:$0xff]  ;;  %v53_v19 = vshrl.u32 %v52_v18, 7 }
  0x1b   :  { %456 = vmatpush1.bf16.msra.mxu0 %v455_v15  ;;  %462 = vmatprep.subr.bf16.mxu1 %v461_v21  ;;  %v467_v33 = vpack.c.bf16 %v144_v30, %v143_v29  ;;  %v469_v34 = vpack.c.bf16 %v162_v32, %v161_v31  ;;  %v145_v35 = vld [vmem:[#allocation2 + $0x30] sm:$0xff]  ;;  %v146_v36 = vld [vmem:[#allocation2 + $0x38] sm:$0xff]  ;;  %v163_v37 = vld [vmem:[#allocation2 + $0xc0] sm:$0xff] }
  0x1c   :  { %v164_v38 = vld [vmem:[#allocation2 + $0xc8] sm:$0xff]  ;;  %v471_v39 = vpack.c.bf16 %v146_v36, %v145_v35  ;;  %v147_v41 = vld [vmem:[#allocation2 + $0x40] sm:$0xff]  ;;  %v165_v43 = vld [vmem:[#allocation2 + $0xd0] sm:$0xff]  ;;  %489 = vmatprep.subr.bf16.mxu0 %v572_v2  ;;  %v54_v20 = vsub.s32 0, %v53_v19  ;;  %v58_v22 = vsub.s32 1, %v53_v19 }
  0x1d   :  { %v473_v40 = vpack.c.bf16 %v164_v38, %v163_v37  ;;  %v148_v42 = vld [vmem:[#allocation2 + $0x48] sm:$0xff]  ;;  %v166_v44 = vld [vmem:[#allocation2 + $0xd8] sm:$0xff]  ;;  %v149_v47 = vld [vmem:[#allocation2 + $0x50] sm:$0xff] }
  0x1e   :  { %359 = vmatmul.mubr.msk.f32.vlgmr.msra.gmra.mrb[0].mxu0 %vm62_vm0, %v41_v27  ;;  %464 = vmatpush3.bf16.msra.mxu1 %v463_v26  ;;  %v475_v45 = vpack.c.bf16 %v148_v42, %v147_v41  ;;  %v477_v46 = vpack.c.bf16 %v166_v44, %v165_v43  ;;  %v150_v48 = vld [vmem:[#allocation2 + $0x58] sm:$0xff]  ;;  %v167_v49 = vld [vmem:[#allocation2 + $0xe0] sm:$0xff]  ;;  %v168_v50 = vld [vmem:[#allocation2 + $0xe8] sm:$0xff] }
  0x1f   :  { %466 = vmatprep.subr.bf16.mxu1 %v465_v28  ;;  %v479_v51 = vpack.c.bf16 %v150_v48, %v149_v47  ;;  %v481_v52 = vpack.c.bf16 %v168_v50, %v167_v49  ;;  %v151_v53 = vld [vmem:[#allocation2 + $0x60] sm:$0xff]  ;;  %v152_v54 = vld [vmem:[#allocation2 + $0x68] sm:$0xff]  ;;  %v169_v56 = vld [vmem:[#allocation2 + $0xf0] sm:$0xff]  ;;  %446 = vmatprep.mubr.msk.f32.mxu0 %vm573_vm1, %v571_v0 }
  0x20   :  { %v483_v55 = vpack.c.bf16 %v152_v54, %v151_v53  ;;  %v170_v57 = vld [vmem:[#allocation2 + $0xf8] sm:$0xff]  ;;  %v153_v59 = vld [vmem:[#allocation2 + $0x70] sm:$0xff]  ;;  %v249_v62 = vld [vmem:[%s730_s5] sm:$0xff] }
  0x21   :  { %v485_v58 = vpack.c.bf16 %v170_v57, %v169_v56  ;;  %v154_v60 = vld [vmem:[#allocation2 + $0x78] sm:$0xff]  ;;  %v250_v63 = vld [vmem:[%s730_s5 + $0x8] sm:$0xff]  ;;  %v251_v1 = vld [vmem:[%s730_s5 + $0x10] sm:$0xff] }
  0x22   :  { %468 = vmatpush3.bf16.msra.mxu1 %v467_v33  ;;  %v487_v61 = vpack.c.bf16 %v154_v60, %v153_v59  ;;  %v490_v3 = vpack.c.bf16 %v250_v63, %v249_v62  ;;  %v252_v4 = vld [vmem:[%s730_s5 + $0x18] sm:$0xff]  ;;  %v253_v6 = vld [vmem:[%s730_s5 + $0x20] sm:$0xff]  ;;  %v254_v7 = vld [vmem:[%s730_s5 + $0x28] sm:$0xff] }
  0x23   :  { %470 = vmatprep.subr.bf16.mxu1 %v469_v34  ;;  %v493_v5 = vpack.c.bf16 %v252_v4, %v251_v1  ;;  %v496_v8 = vpack.c.bf16 %v254_v7, %v253_v6  ;;  %v255_v9 = vld [vmem:[%s730_s5 + $0x30] sm:$0xff]  ;;  %v256_v10 = vld [vmem:[%s730_s5 + $0x38] sm:$0xff]  ;;  %v257_v12 = vld [vmem:[%s730_s5 + $0x40] sm:$0xff] }
  0x24   :  { %491 = vmatpush3.bf16.msra.mxu0 %v490_v3  ;;  %v499_v11 = vpack.c.bf16 %v256_v10, %v255_v9  ;;  %v258_v13 = vld [vmem:[%s730_s5 + $0x48] sm:$0xff]  ;;  %v259_v15 = vld [vmem:[%s730_s5 + $0x50] sm:$0xff]  ;;  %v260_v16 = vld [vmem:[%s730_s5 + $0x58] sm:$0xff] }
  0x25   :  { %492 = vmatprep.subr.bf16.mxu0 %v572_v2  ;;  %v502_v14 = vpack.c.bf16 %v258_v13, %v257_v12  ;;  %v505_v17 = vpack.c.bf16 %v260_v16, %v259_v15  ;;  %v50_v21 = vld [vmem:[%s727_s2] sm:$0x3]  ;;  %v262_v32 = vld [vmem:[%s730_s5 + $0x68] sm:$0xff]  ;;  %v263_v34 = vld [vmem:[%s730_s5 + $0x70] sm:$0xff] }
  0x26   :  { %472 = vmatpush3.bf16.msra.mxu1 %v471_v39  ;;  %v55_v23 = vrot.slane %v50_v21, %v54_v20  ;;  %v59_v24 = vrot.slane %v50_v21, %v58_v22  ;;  %v261_v31 = vld [vmem:[%s730_s5 + $0x60] sm:$0xff]  ;;  %v264_v35 = vld [vmem:[%s730_s5 + $0x78] sm:$0xff]  ;;  %s574_s5 = smov [#allocation5]  }
  0x27   :  { %474 = vmatprep.subr.bf16.mxu1 %v473_v40  ;;  %v508_v33 = vpack.c.bf16 %v262_v32, %v261_v31  ;;  %v511_v36 = vpack.c.bf16 %v264_v35, %v263_v34  ;;  %v360_v38 = vld [vmem:[%s729_s4] ss:$0 sm:$0xff]  ;;  %s350_s18 = sshll.u32 %s574_s5, 4  ;;  %s351_s18 = int_to_ptr.vmem [resolvable:$true] %s350_s18 }
  0x28   :  { %494 = vmatpush3.bf16.msra.mxu0 %v493_v5  ;;  %v361_v43 = vld [vmem:[%s731_s6] ss:$0 sm:$0xff]  ;;  %s542_s19 = scalar_lea.vmem %s351_s18, 128  ;;  %p547_p9 = scmp.lt.s32.totalorder %s351_s18, %s351_s18 }
  0x29   :  { %495 = vmatprep.subr.bf16.mxu0 %v572_v2  ;;  %p543_p8 = scmp.ne.s32.totalorder %s351_s18, %s542_s19  ;;  %p548_p10 = scmp.lt.s32.totalorder %s542_s19, %s542_s19 }
  0x2a   :  { %476 = vmatpush3.bf16.msra.mxu1 %v475_v45 }
  0x2b   :  { %478 = vmatprep.subr.bf16.mxu1 %v477_v46  ;;  %p549_p11 = por %p548_p10, %p547_p9 }
  0x2c   :  { %497 = vmatpush3.bf16.msra.mxu0 %v496_v8 }
  0x2d   :  { %498 = vmatprep.subr.bf16.mxu0 %v572_v2  ;;  %p550_p12 = pnand %p549_p11, %p543_p8 }
  0x2e   :  { %480 = vmatpush3.bf16.msra.mxu1 %v479_v51 }
  0x2f   :  { %482 = vmatprep.subr.bf16.mxu1 %v481_v52 }
  0x30   :  { %500 = vmatpush3.bf16.msra.mxu0 %v499_v11 }
  0x31   :  { %501 = vmatprep.subr.bf16.mxu0 %v572_v2 }
  0x32   :  { %484 = vmatpush3.bf16.msra.mxu1 %v483_v55 }
  0x33   :  { %486 = vmatprep.subr.bf16.mxu1 %v485_v58 }
  0x34   :  { %503 = vmatpush3.bf16.msra.mxu0 %v502_v14 }
  0x35   :  { %504 = vmatprep.subr.bf16.mxu0 %v572_v2 }
  0x36   :  { %488 = vmatpush3.bf16.msra.mxu1 %v487_v61 }
  0x38   :  { %506 = vmatpush3.bf16.msra.mxu0 %v505_v17 }
  0x39   :  { %507 = vmatprep.subr.bf16.mxu0 %v572_v2 }
  0x3c   :  { %509 = vmatpush3.bf16.msra.mxu0 %v508_v33 }
  0x3d   :  { %510 = vmatprep.subr.bf16.mxu0 %v572_v2 }
  0x40   :  { %512 = vmatpush3.bf16.msra.mxu0 %v511_v36 }
  0xf1   :  { %v132_v25 = vpop.f32.mrb[0].mxu0 }
  0xf2   :  { %v133_v26 = vadd.f32 %v132_v25, %v55_v23  ;;  %v134_v27 = vpop.f32.mrb[1].mxu0 }
  0xf3   :  { %v135_v28 = vadd.f32 %v134_v27, %v59_v24 }
  0xf4   :  { %v137_v30 = vmax.f32 %v133_v26, 0.0 }
  0xf5   :  { %v138_v29 = vmax.f32 %v135_v28, 0.0 }
  0xf7   :  { %242 = vmatprep.mubr.f32.mxu1 %v138_v29 }
  0xf8   :  { %243 = vmatmul.mubr.f32.vlgmr.msra.gmra.mrb[0].mxu1 %v137_v30 }
 0x1cb   :  { %v394_v37 = vpop.f32.mrb[0].mxu1 }
 0x1cc   :  { %v395_v39 = vpop.f32.mrb[1].mxu1 }
 0x1cd   :  { %v396_v40 = vadd.f32 %v395_v39, %v394_v37 }
 0x1cf   :  { %v245_v41 = vadd.f32 %v396_v40, %v360_v38 }
 0x1d1   :  { %v248_v42 = vmax.f32 %v245_v41, 0.0 }
 0x1d3   :  { %447 = vmatmul.mubr.f32.vlgmr.msra.gmra.mrb[2].mxu0 %v248_v42 }
 0x2a6   :  { %v338_v44 = vpop.f32.mrb[2].mxu0 }
 0x2a7   :  { %v339_v45 = vadd.f32 %v361_v43, %v338_v44  ;;  %v448_v0 = vpop.f32.mrb[3].mxu0 }
 0x2a9   :  { %343 = vst.msk [vmem:[#allocation5] sm:$0xff] %vm342_vm2, %v339_v45 }
 0x2aa   :  { %553 = shalt.err (!%p550_p12)
}
 0x2ab   :  { %s554_s21 = scalar_lea.hbm %s732_s7, 128 }
 0x2ac   :  { %p555_p13 = scmp.ne.s32.totalorder %s732_s7, %s554_s21  ;;  %p558_p0 = scmp.lt.u32.totalorder %s554_s21, %s732_s7 }
 0x2ae   :  { %p560_p1 = pnand %p558_p0, %p555_p13 }
 0x2b0   :  { %563 = shalt.err (!%p560_p1)
}
 0x2b1   :  { %353 = dma.vmem_to_hbm [thread:$0]  %s351_s18, 128, %s732_s7, [#allocation4]  }
 0x2b2   :  { %566 = dma.done.wait [#allocation4], 128  }
 0x2b3   :  { %567 = vsyncadd [#allocation4], 4294967168 }
 0x2b4   :  { %357 = vsyncpa [#allocation3], 1 }
 0x2b5   :  { %358 = vsyncpa [#allocation4], 1 }

</bundles_post_ra>
